<compile_context>
chip_gen: v5e
topology: v5e:2x2
jax: 0.10.0
libtpu: 0.0.40
codegen_flags: <defaults>
</compile_context>

<pallas_src>
import numpy as np
import jax
import jax.numpy as jnp
from jax.experimental import pallas as pl
from jax.experimental.pallas import tpu as pltpu

EPS = 1e-5
C_OUT, KH, KW = 16, 3, 3
OH = OW = 10          # ((16 + 2*3) - 3)//2 + 1
PH = PW = 6           # ((10 + 2*1) - 2)//2 + 1
LANE = 128            # per-sample lane slab: 100 conv pixels / 36 pooled pixels, padded


def _pool_select_single():
    """Per-sample 0/1 gather matrix (128, 4*128) for ZeroPad2d(1)+MaxPool2d(2,2).

    Row  r*10+c        : conv pixel (r, c)   (rows 100..127 are zero -> pad
                         lanes of y can never reach the output).
    Col  k*128 + ph*6+pw: window corner k of pooled pixel (ph, pw).  Corners
                         falling outside the 10x10 map hit an all-zero column,
                         i.e. contribute 0 = the ZeroPad2d value (safe because
                         ReLU runs before the pool, so y >= 0).
    """
    sel = np.zeros((LANE, 4 * LANE), np.float32)
    for k, (dr, dc) in enumerate(((0, 0), (0, 1), (1, 0), (1, 1))):
        for ph in range(PH):
            for pw in range(PW):
                r, c = 2 * ph - 1 + dr, 2 * pw - 1 + dc
                if 0 <= r < OH and 0 <= c < OW:
                    sel[r * OW + c, k * LANE + ph * PW + pw] = 1.0
    return sel


_POOL_SEL = _pool_select_single()


# ----------------------------------------------------------------------------
# Fused kernel: conv (VPU FMAs) + BN(training stats) + ReLU
#               + ZeroPad2d(1) + 2x2/stride-2 maxpool (per-sample gather matmul)
# ----------------------------------------------------------------------------
def fused_conv1_kernel(p_ref, w_ref, prm_ref, sel_ref, o_ref):
    n_batch = p_ref.shape[1] // LANE          # static at trace time

    # ---- conv as 9 broadcast FMAs (MXU with K=9, M=16 would be ~1% utilized).
    # Conv bias dropped: it cancels exactly in training-mode BatchNorm.
    z = w_ref[:, 0:1] * p_ref[0:1, :]
    for k in range(1, KH * KW):
        z = z + w_ref[:, k:k + 1] * p_ref[k:k + 1, :]        # (16, N*128)

    # ---- BatchNorm2d (training mode, biased batch stats), single pass.
    # Pad lanes of z are exact zeros (zero im2col pad columns, no bias), so
    # s1/s2 are unaffected; inv_n counts only the 100 valid pixels per sample.
    inv_n = 1.0 / (n_batch * OH * OW)
    s1 = jnp.sum(z, axis=1, keepdims=True)                   # (16, 1)
    s2 = jnp.sum(z * z, axis=1, keepdims=True)               # (16, 1)
    mean = s1 * inv_n
    var = s2 * inv_n - mean * mean
    scale = prm_ref[:, 0:1] * jax.lax.rsqrt(var + EPS)       # gamma / sqrt(var+eps)
    shift = prm_ref[:, 1:2] - mean * scale                   # beta - mean*scale
    y = jnp.maximum(z * scale + shift, 0.0)                  # BN + ReLU  (16, N*128)

    # ---- ZeroPad2d(1) + MaxPool2d(2,2): one wide per-sample gather matmul
    # (16,128)@(128,512) producing all four window corners at once, then a max
    # over the four 128-aligned lane chunks.  Output stored batch-major on
    # sublanes, lane-dense (128-wide unmasked stores).
    sel = sel_ref[...]                                       # (128, 512)
    for n in range(n_batch):
        y_n = y[:, n * LANE:(n + 1) * LANE]                  # (16, 128)
        corners = jnp.dot(y_n, sel, preferred_element_type=jnp.float32)
        m = jnp.maximum(
            jnp.maximum(corners[:, 0:LANE], corners[:, LANE:2 * LANE]),
            jnp.maximum(corners[:, 2 * LANE:3 * LANE], corners[:, 3 * LANE:4 * LANE]))
        o_ref[n * C_OUT:(n + 1) * C_OUT, :] = m              # (16, 128) slab


def _full_spec(shape):
    return pl.BlockSpec(shape, lambda i: (0,) * len(shape))


@jax.jit
def conv1_forward(x, w, b, gamma, beta):
    """Pallas forward of the PyTorch `conv1` module. x: (N,1,16,16) -> (N,16,6,6)."""
    del b  # conv bias cancels exactly in training-mode BatchNorm
    n_batch = x.shape[0]

    # -- glue: ZeroPad2d(3) + im2col, per-sample lane-padded 100 -> 128.
    # TODO(synk): the stride-2 tap extraction stays as XLA glue; in-kernel
    # stride-2 loads along the lane dim have no native TPU support.
    xp = jnp.pad(x, ((0, 0), (0, 0), (3, 3), (3, 3)))                # (N,1,22,22)
    taps = [xp[:, 0, kh:kh + 2 * OH:2, kw:kw + 2 * OW:2]             # (N,10,10)
            for kh in range(KH) for kw in range(KW)]
    patches = jnp.stack(taps, axis=0).reshape(KH * KW, n_batch, OH * OW)
    p_t = jnp.pad(patches, ((0, 0), (0, 0), (0, LANE - OH * OW)))
    p_t = p_t.reshape(KH * KW, n_batch * LANE)                       # (9, N*128)

    w_mat = w.reshape(C_OUT, KH * KW)                                # (16, 9)
    prm = jnp.stack([gamma, beta], axis=1)                           # (16, 2)
    sel = jnp.asarray(_POOL_SEL)                                     # (128, 512), O(1) in N

    pooled = pl.pallas_call(
        fused_conv1_kernel,
        out_shape=jax.ShapeDtypeStruct((n_batch * C_OUT, LANE), jnp.float32),
        grid=(1,),
        in_specs=[_full_spec((KH * KW, n_batch * LANE)),
                  _full_spec((C_OUT, KH * KW)),
                  _full_spec((C_OUT, 2)),
                  _full_spec((LANE, 4 * LANE))],
        out_specs=_full_spec((n_batch * C_OUT, LANE)),
        compiler_params=pltpu.CompilerParams(
            dimension_semantics=("arbitrary",)),
    )(p_t, w_mat, prm, sel)

    # already batch-major on sublanes: just crop the per-sample lane padding.
    return pooled.reshape(n_batch, C_OUT, LANE)[:, :, :PH * PW] \
                 .reshape(n_batch, C_OUT, PH, PW)


# ----------------------------------------------------------------------------
# Pure-JAX reference (mirrors the PyTorch forward) for a correctness check.
# ----------------------------------------------------------------------------
def conv1_reference(x, w, b, gamma, beta):
    xp = jnp.pad(x, ((0, 0), (0, 0), (3, 3), (3, 3)))
    z = jax.lax.conv_general_dilated(
        xp, w, window_strides=(2, 2), padding="VALID",
        dimension_numbers=("NCHW", "OIHW", "NCHW")) + b[None, :, None, None]
    mean = z.mean(axis=(0, 2, 3), keepdims=True)
    var = ((z - mean) ** 2).mean(axis=(0, 2, 3), keepdims=True)
    y = (z - mean) * jax.lax.rsqrt(var + EPS)
    y = y * gamma[None, :, None, None] + beta[None, :, None, None]
    y = jnp.maximum(y, 0.0)
    yp = jnp.pad(y, ((0, 0), (0, 0), (1, 1), (1, 1)))
    return jax.lax.reduce_window(yp, -jnp.inf, jax.lax.max,
                                 (1, 1, 2, 2), (1, 1, 2, 2), "VALID")


if __name__ == "__main__":
    key = jax.random.PRNGKey(0)
    kx, kw, kb, kg, kbt = jax.random.split(key, 5)

    # deterministic synthetic parameters (shapes from the module __init__)
    w = jax.random.normal(kw, (16, 1, 3, 3), jnp.float32) * 0.3    # Conv2d weight
    b = jax.random.normal(kb, (16,), jnp.float32) * 0.1            # Conv2d bias
    gamma = 1.0 + 0.1 * jax.random.normal(kg, (16,), jnp.float32)  # BN weight
    beta = 0.1 * jax.random.normal(kbt, (16,), jnp.float32)        # BN bias

    x = jax.random.normal(kx, (2, 1, 16, 16), jnp.float32)         # NCHW input

    out = jax.block_until_ready(conv1_forward(x, w, b, gamma, beta))
    ref = jax.block_until_ready(conv1_reference(x, w, b, gamma, beta))

    assert out.shape == (2, 16, 6, 6), out.shape
    assert jnp.allclose(out, ref, rtol=1e-3, atol=1e-4), \
        float(jnp.max(jnp.abs(out - ref)))
    print("KERNEL_OK")
</pallas_src>

<mosaic_0001>
module attributes {stable_mosaic.version = 11 : i64} {
  func.func @fused_conv1_kernel(%arg0: i32, %arg1: memref<9x256xf32, #tpu.memory_space<vmem>>, %arg2: memref<16x9xf32, #tpu.memory_space<vmem>>, %arg3: memref<16x2xf32, #tpu.memory_space<vmem>>, %arg4: memref<128x512xf32, #tpu.memory_space<vmem>>, %arg5: memref<32x128xf32, #tpu.memory_space<vmem>>) attributes {dimension_semantics = [#tpu.dimension_semantics<arbitrary>], iteration_bounds = array<i64: 1>, scalar_prefetch = 0 : i64, scratch_operands = 0 : i64, tpu.core_type = #tpu.core_type<tc>, window_params = [{pipeline_mode = #tpu.pipeline_mode<synchronous>, transform_indices = @transform_0, window_bounds = array<i64: 9, 256>}, {pipeline_mode = #tpu.pipeline_mode<synchronous>, transform_indices = @transform_1, window_bounds = array<i64: 16, 9>}, {pipeline_mode = #tpu.pipeline_mode<synchronous>, transform_indices = @transform_2, window_bounds = array<i64: 16, 2>}, {pipeline_mode = #tpu.pipeline_mode<synchronous>, transform_indices = @transform_3, window_bounds = array<i64: 128, 512>}, {pipeline_mode = #tpu.pipeline_mode<synchronous>, transform_indices = @transform_4, window_bounds = array<i64: 32, 128>}]} {
    %c0 = arith.constant 0 : index
    %c0_0 = arith.constant 0 : index
    %0 = vector.load %arg2[%c0, %c0_0] : memref<16x9xf32, #tpu.memory_space<vmem>>, vector<16x1xf32>
    %c0_1 = arith.constant 0 : index
    %c0_2 = arith.constant 0 : index
    %1 = vector.load %arg1[%c0_1, %c0_2] : memref<9x256xf32, #tpu.memory_space<vmem>>, vector<1x256xf32>
    %2 = vector.broadcast %0 : vector<16x1xf32> to vector<16x256xf32>
    %3 = vector.broadcast %1 : vector<1x256xf32> to vector<16x256xf32>
    %4 = arith.mulf %2, %3 : vector<16x256xf32>
    %c0_3 = arith.constant 0 : index
    %c1 = arith.constant 1 : index
    %5 = vector.load %arg2[%c0_3, %c1] : memref<16x9xf32, #tpu.memory_space<vmem>>, vector<16x1xf32>
    %c1_4 = arith.constant 1 : index
    %c0_5 = arith.constant 0 : index
    %6 = vector.load %arg1[%c1_4, %c0_5] : memref<9x256xf32, #tpu.memory_space<vmem>>, vector<1x256xf32>
    %7 = vector.broadcast %5 : vector<16x1xf32> to vector<16x256xf32>
    %8 = vector.broadcast %6 : vector<1x256xf32> to vector<16x256xf32>
    %9 = arith.mulf %7, %8 : vector<16x256xf32>
    %10 = arith.addf %4, %9 : vector<16x256xf32>
    %c0_6 = arith.constant 0 : index
    %c2 = arith.constant 2 : index
    %11 = vector.load %arg2[%c0_6, %c2] : memref<16x9xf32, #tpu.memory_space<vmem>>, vector<16x1xf32>
    %c2_7 = arith.constant 2 : index
    %c0_8 = arith.constant 0 : index
    %12 = vector.load %arg1[%c2_7, %c0_8] : memref<9x256xf32, #tpu.memory_space<vmem>>, vector<1x256xf32>
    %13 = vector.broadcast %11 : vector<16x1xf32> to vector<16x256xf32>
    %14 = vector.broadcast %12 : vector<1x256xf32> to vector<16x256xf32>
    %15 = arith.mulf %13, %14 : vector<16x256xf32>
    %16 = arith.addf %10, %15 : vector<16x256xf32>
    %c0_9 = arith.constant 0 : index
    %c3 = arith.constant 3 : index
    %17 = vector.load %arg2[%c0_9, %c3] : memref<16x9xf32, #tpu.memory_space<vmem>>, vector<16x1xf32>
    %c3_10 = arith.constant 3 : index
    %c0_11 = arith.constant 0 : index
    %18 = vector.load %arg1[%c3_10, %c0_11] : memref<9x256xf32, #tpu.memory_space<vmem>>, vector<1x256xf32>
    %19 = vector.broadcast %17 : vector<16x1xf32> to vector<16x256xf32>
    %20 = vector.broadcast %18 : vector<1x256xf32> to vector<16x256xf32>
    %21 = arith.mulf %19, %20 : vector<16x256xf32>
    %22 = arith.addf %16, %21 : vector<16x256xf32>
    %c0_12 = arith.constant 0 : index
    %c4 = arith.constant 4 : index
    %23 = vector.load %arg2[%c0_12, %c4] : memref<16x9xf32, #tpu.memory_space<vmem>>, vector<16x1xf32>
    %c4_13 = arith.constant 4 : index
    %c0_14 = arith.constant 0 : index
    %24 = vector.load %arg1[%c4_13, %c0_14] : memref<9x256xf32, #tpu.memory_space<vmem>>, vector<1x256xf32>
    %25 = vector.broadcast %23 : vector<16x1xf32> to vector<16x256xf32>
    %26 = vector.broadcast %24 : vector<1x256xf32> to vector<16x256xf32>
    %27 = arith.mulf %25, %26 : vector<16x256xf32>
    %28 = arith.addf %22, %27 : vector<16x256xf32>
    %c0_15 = arith.constant 0 : index
    %c5 = arith.constant 5 : index
    %29 = vector.load %arg2[%c0_15, %c5] : memref<16x9xf32, #tpu.memory_space<vmem>>, vector<16x1xf32>
    %c5_16 = arith.constant 5 : index
    %c0_17 = arith.constant 0 : index
    %30 = vector.load %arg1[%c5_16, %c0_17] : memref<9x256xf32, #tpu.memory_space<vmem>>, vector<1x256xf32>
    %31 = vector.broadcast %29 : vector<16x1xf32> to vector<16x256xf32>
    %32 = vector.broadcast %30 : vector<1x256xf32> to vector<16x256xf32>
    %33 = arith.mulf %31, %32 : vector<16x256xf32>
    %34 = arith.addf %28, %33 : vector<16x256xf32>
    %c0_18 = arith.constant 0 : index
    %c6 = arith.constant 6 : index
    %35 = vector.load %arg2[%c0_18, %c6] : memref<16x9xf32, #tpu.memory_space<vmem>>, vector<16x1xf32>
    %c6_19 = arith.constant 6 : index
    %c0_20 = arith.constant 0 : index
    %36 = vector.load %arg1[%c6_19, %c0_20] : memref<9x256xf32, #tpu.memory_space<vmem>>, vector<1x256xf32>
    %37 = vector.broadcast %35 : vector<16x1xf32> to vector<16x256xf32>
    %38 = vector.broadcast %36 : vector<1x256xf32> to vector<16x256xf32>
    %39 = arith.mulf %37, %38 : vector<16x256xf32>
    %40 = arith.addf %34, %39 : vector<16x256xf32>
    %c0_21 = arith.constant 0 : index
    %c7 = arith.constant 7 : index
    %41 = vector.load %arg2[%c0_21, %c7] : memref<16x9xf32, #tpu.memory_space<vmem>>, vector<16x1xf32>
    %c7_22 = arith.constant 7 : index
    %c0_23 = arith.constant 0 : index
    %42 = vector.load %arg1[%c7_22, %c0_23] : memref<9x256xf32, #tpu.memory_space<vmem>>, vector<1x256xf32>
    %43 = vector.broadcast %41 : vector<16x1xf32> to vector<16x256xf32>
    %44 = vector.broadcast %42 : vector<1x256xf32> to vector<16x256xf32>
    %45 = arith.mulf %43, %44 : vector<16x256xf32>
    %46 = arith.addf %40, %45 : vector<16x256xf32>
    %c0_24 = arith.constant 0 : index
    %c8 = arith.constant 8 : index
    %47 = vector.load %arg2[%c0_24, %c8] : memref<16x9xf32, #tpu.memory_space<vmem>>, vector<16x1xf32>
    %c8_25 = arith.constant 8 : index
    %c0_26 = arith.constant 0 : index
    %48 = vector.load %arg1[%c8_25, %c0_26] : memref<9x256xf32, #tpu.memory_space<vmem>>, vector<1x256xf32>
    %49 = vector.broadcast %47 : vector<16x1xf32> to vector<16x256xf32>
    %50 = vector.broadcast %48 : vector<1x256xf32> to vector<16x256xf32>
    %51 = arith.mulf %49, %50 : vector<16x256xf32>
    %52 = arith.addf %46, %51 : vector<16x256xf32>
    %cst = arith.constant dense<0.000000e+00> : vector<16xf32>
    %53 = vector.multi_reduction <add>, %52, %cst [1] : vector<16x256xf32> to vector<16xf32>
    %54 = vector.shape_cast %53 : vector<16xf32> to vector<16x1xf32>
    %55 = arith.mulf %52, %52 : vector<16x256xf32>
    %cst_27 = arith.constant dense<0.000000e+00> : vector<16xf32>
    %56 = vector.multi_reduction <add>, %55, %cst_27 [1] : vector<16x256xf32> to vector<16xf32>
    %57 = vector.shape_cast %56 : vector<16xf32> to vector<16x1xf32>
    %cst_28 = arith.constant 5.000000e-03 : f32
    %58 = vector.broadcast %cst_28 : f32 to vector<16x1xf32>
    %59 = arith.mulf %54, %58 : vector<16x1xf32>
    %cst_29 = arith.constant 5.000000e-03 : f32
    %60 = vector.broadcast %cst_29 : f32 to vector<16x1xf32>
    %61 = arith.mulf %57, %60 : vector<16x1xf32>
    %62 = arith.mulf %59, %59 : vector<16x1xf32>
    %63 = arith.subf %61, %62 : vector<16x1xf32>
    %c0_30 = arith.constant 0 : index
    %c0_31 = arith.constant 0 : index
    %64 = vector.load %arg3[%c0_30, %c0_31] : memref<16x2xf32, #tpu.memory_space<vmem>>, vector<16x1xf32>
    %cst_32 = arith.constant 9.99999974E-6 : f32
    %65 = vector.broadcast %cst_32 : f32 to vector<16x1xf32>
    %66 = arith.addf %63, %65 : vector<16x1xf32>
    %67 = math.rsqrt %66 : vector<16x1xf32>
    %68 = arith.mulf %64, %67 : vector<16x1xf32>
    %c0_33 = arith.constant 0 : index
    %c1_34 = arith.constant 1 : index
    %69 = vector.load %arg3[%c0_33, %c1_34] : memref<16x2xf32, #tpu.memory_space<vmem>>, vector<16x1xf32>
    %70 = arith.mulf %59, %68 : vector<16x1xf32>
    %71 = arith.subf %69, %70 : vector<16x1xf32>
    %72 = vector.broadcast %68 : vector<16x1xf32> to vector<16x256xf32>
    %73 = arith.mulf %52, %72 : vector<16x256xf32>
    %74 = vector.broadcast %71 : vector<16x1xf32> to vector<16x256xf32>
    %75 = arith.addf %73, %74 : vector<16x256xf32>
    %cst_35 = arith.constant 0.000000e+00 : f32
    %76 = vector.broadcast %cst_35 : f32 to vector<16x256xf32>
    %77 = arith.maximumf %75, %76 : vector<16x256xf32>
    %c0_36 = arith.constant 0 : index
    %c0_37 = arith.constant 0 : index
    %78 = vector.load %arg4[%c0_36, %c0_37] : memref<128x512xf32, #tpu.memory_space<vmem>>, vector<128x512xf32>
    %79 = vector.extract_strided_slice %77 {offsets = [0, 0], sizes = [16, 128], strides = [1, 1]} : vector<16x256xf32> to vector<16x128xf32>
    %cst_38 = arith.constant dense<0.000000e+00> : vector<16x512xf32>
    %80 = tpu.matmul %79, %78, %cst_38 {dimension_numbers = #tpu.dot_dimension_numbers<[1], [0], [0], [1], [0, 0, 1, 1], [], []>} : vector<16x128xf32>, vector<128x512xf32>, vector<16x512xf32> -> vector<16x512xf32>
    %81 = vector.extract_strided_slice %80 {offsets = [0, 0], sizes = [16, 128], strides = [1, 1]} : vector<16x512xf32> to vector<16x128xf32>
    %82 = vector.extract_strided_slice %80 {offsets = [0, 128], sizes = [16, 128], strides = [1, 1]} : vector<16x512xf32> to vector<16x128xf32>
    %83 = arith.maximumf %81, %82 : vector<16x128xf32>
    %84 = vector.extract_strided_slice %80 {offsets = [0, 256], sizes = [16, 128], strides = [1, 1]} : vector<16x512xf32> to vector<16x128xf32>
    %85 = vector.extract_strided_slice %80 {offsets = [0, 384], sizes = [16, 128], strides = [1, 1]} : vector<16x512xf32> to vector<16x128xf32>
    %86 = arith.maximumf %84, %85 : vector<16x128xf32>
    %87 = arith.maximumf %83, %86 : vector<16x128xf32>
    %c0_39 = arith.constant 0 : index
    %c0_40 = arith.constant 0 : index
    %88 = vector.load %arg5[%c0_39, %c0_40] : memref<32x128xf32, #tpu.memory_space<vmem>>, vector<16x128xf32>
    tpu.vector_store %arg5[%c0_39, %c0_40], %87 {strides = array<i32>} : memref<32x128xf32, #tpu.memory_space<vmem>>, vector<16x128xf32>,
    %89 = vector.extract_strided_slice %77 {offsets = [0, 128], sizes = [16, 128], strides = [1, 1]} : vector<16x256xf32> to vector<16x128xf32>
    %cst_41 = arith.constant dense<0.000000e+00> : vector<16x512xf32>
    %90 = tpu.matmul %89, %78, %cst_41 {dimension_numbers = #tpu.dot_dimension_numbers<[1], [0], [0], [1], [0, 0, 1, 1], [], []>} : vector<16x128xf32>, vector<128x512xf32>, vector<16x512xf32> -> vector<16x512xf32>
    %91 = vector.extract_strided_slice %90 {offsets = [0, 0], sizes = [16, 128], strides = [1, 1]} : vector<16x512xf32> to vector<16x128xf32>
    %92 = vector.extract_strided_slice %90 {offsets = [0, 128], sizes = [16, 128], strides = [1, 1]} : vector<16x512xf32> to vector<16x128xf32>
    %93 = arith.maximumf %91, %92 : vector<16x128xf32>
    %94 = vector.extract_strided_slice %90 {offsets = [0, 256], sizes = [16, 128], strides = [1, 1]} : vector<16x512xf32> to vector<16x128xf32>
    %95 = vector.extract_strided_slice %90 {offsets = [0, 384], sizes = [16, 128], strides = [1, 1]} : vector<16x512xf32> to vector<16x128xf32>
    %96 = arith.maximumf %94, %95 : vector<16x128xf32>
    %97 = arith.maximumf %93, %96 : vector<16x128xf32>
    %c16 = arith.constant 16 : index
    %c0_42 = arith.constant 0 : index
    %98 = vector.load %arg5[%c16, %c0_42] : memref<32x128xf32, #tpu.memory_space<vmem>>, vector<16x128xf32>
    tpu.vector_store %arg5[%c16, %c0_42], %97 {strides = array<i32>} : memref<32x128xf32, #tpu.memory_space<vmem>>, vector<16x128xf32>,
    return
  }
  func.func @transform_0(%arg0: i32) -> (i32, i32) {
    %c0_i32 = arith.constant 0 : i32
    %c0_i32_0 = arith.constant 0 : i32
    %c0_i32_1 = arith.constant 0 : i32
    return %c0_i32, %c0_i32_0 : i32, i32
  }
  func.func @transform_1(%arg0: i32) -> (i32, i32) {
    %c0_i32 = arith.constant 0 : i32
    %c0_i32_0 = arith.constant 0 : i32
    %c0_i32_1 = arith.constant 0 : i32
    return %c0_i32, %c0_i32_0 : i32, i32
  }
  func.func @transform_2(%arg0: i32) -> (i32, i32) {
    %c0_i32 = arith.constant 0 : i32
    %c0_i32_0 = arith.constant 0 : i32
    %c0_i32_1 = arith.constant 0 : i32
    return %c0_i32, %c0_i32_0 : i32, i32
  }
  func.func @transform_3(%arg0: i32) -> (i32, i32) {
    %c0_i32 = arith.constant 0 : i32
    %c0_i32_0 = arith.constant 0 : i32
    %c0_i32_1 = arith.constant 0 : i32
    return %c0_i32, %c0_i32_0 : i32, i32
  }
  func.func @transform_4(%arg0: i32) -> (i32, i32) {
    %c0_i32 = arith.constant 0 : i32
    %c0_i32_0 = arith.constant 0 : i32
    %c0_i32_1 = arith.constant 0 : i32
    return %c0_i32, %c0_i32_0 : i32, i32
  }
}

</mosaic_0001>

<bundles_post_ra>
// kernel: conv1_forward.1
= control target key start
LH: loop header
LB: loop body
LE: loop exit
PB: predicated region body
PF: predicated region fallthrough
CT: control target
= control target key end

     0   :  { %v629_v0 = vmov 2   ;;  %v630_v1 = vmov 0   ;;  %v631_v3 = vmov 4   ;;  %v632_v4 = vmov 3   ;;  %s638_s11 = smov 1   ;;  %s1219_s1 = inlined_call_operand.vmem [shape: f32[16,9], index: 1, kind: input, shape index: {}]   ;;  %s1220_s0 = inlined_call_operand.vmem [shape: f32[9,256], index: 0, kind: input, shape index: {}]   ;;  %s1221_s2 = inlined_call_operand.vmem [shape: f32[16,2], index: 2, kind: input, shape index: {}]   ;;  %s1222_s3 = inlined_call_operand.vmem [shape: f32[128,512], index: 3, kind: input, shape index: {}]   ;;  %s1223_s4 = inlined_call_operand.vmem [shape: f32[32,128], index: 4, kind: output, shape index: {}]  }
   0x1   :  { %605 = vset.pattern.permute.xlu1 %v629_v0  ;;  %603 = vset.pattern.permute.xlu0 %v630_v1  ;;  %v17_v2 = vld [vmem:[%s1219_s1] sm:$0xff]  ;;  %v633_v5 = vmov 1   ;;  %v18_v6 = vld [vmem:[%s1219_s1 + $0x8] sm:$0xff]  ;;  %v634_v7 = vmov 5   ;;  %v635_v8 = vmov 6   ;;  %v636_v9 = vmov 8  }
   0x2   :  { %65 = vperm.xlu1 %605, %v17_v2   ;;  %22 = vperm.xlu0 %603, %v17_v2   ;;  %v637_v10 = vmov 7   ;;  %v19_v15 = vld [vmem:[%s1220_s0] ss:$8 sm:$0x3] }
   0x3   :  { %607 = vset.pattern.permute.xlu2 %v631_v3  ;;  %v585_v16 = vld [vmem:[%s1220_s0 + $0x1] ss:$8 sm:$0x3]  ;;  %v31_v18 = vperm.slane %v19_v15, 0  ;;  %v32_v19 = vperm.slane %v19_v15, 1 }
   0x4   :  { %111 = vperm.xlu2 %607, %v17_v2   ;;  %v50_v20 = vperm.slane %v585_v16, 0  ;;  %v51_v21 = vperm.slane %v585_v16, 1  ;;  %v586_v24 = vld [vmem:[%s1220_s0 + $0x2] ss:$8 sm:$0x3] }
   0x5   :  { %v73_v29 = vperm.slane %v586_v24, 0  ;;  %v74_v30 = vperm.slane %v586_v24, 1  ;;  %v685_v31 = vld [vmem:[%s1220_s0 + $0x3] ss:$8 sm:$0x3] }
   0x6   :  { %v96_v37 = vperm.slane %v685_v31, 0  ;;  %v97_v38 = vperm.slane %v685_v31, 1  ;;  %v692_v39 = vld [vmem:[%s1220_s0 + $0x4] ss:$8 sm:$0x3] }
   0x7   :  { %v697_v43 = vld [vmem:[%s1220_s0 + $0x5] ss:$8 sm:$0x3]  ;;  %v119_v44 = vperm.slane %v692_v39, 0  ;;  %v120_v45 = vperm.slane %v692_v39, 1 }
   0x8   :  { %v704_v49 = vld [vmem:[%s1220_s0 + $0x6] ss:$8 sm:$0x3]  ;;  %v142_v50 = vperm.slane %v697_v43, 0  ;;  %v143_v51 = vperm.slane %v697_v43, 1 }
   0x9   :  { %v165_v57 = vperm.slane %v704_v49, 0  ;;  %v166_v58 = vperm.slane %v704_v49, 1  ;;  %v713_v59 = vld [vmem:[%s1220_s0 + $0x10] ss:$8 sm:$0x3] }
   0xa   :  { %606 = vset.pattern.permute.xlu1 %v632_v4  ;;  %604 = vset.pattern.permute.xlu0 %v633_v5  ;;  %v718_v62 = vld [vmem:[%s1220_s0 + $0x7] ss:$8 sm:$0x3] }
   0xb   :  { %88 = vperm.xlu1 %606, %v17_v2   ;;  %42 = vperm.xlu0 %604, %v17_v2  }
   0xc   :  { %608 = vset.pattern.permute.xlu2 %v630_v1 }
   0xd   :  { %27 = vperm.xlu2 %608, %v18_v6  }
  0x13   :  { %609 = vset.pattern.permute.xlu1 %v633_v5  ;;  %611 = vset.pattern.permute.xlu0 %v629_v0 }
  0x14   :  { %46 = vperm.xlu1 %609, %v18_v6   ;;  %69 = vperm.xlu0 %611, %v18_v6  }
  0x15   :  { %610 = vset.pattern.permute.xlu2 %v634_v7 }
  0x16   :  { %134 = vperm.xlu2 %610, %v17_v2  }
  0x1c   :  { %612 = vset.pattern.permute.xlu1 %v635_v8  ;;  %616 = vset.pattern.permute.xlu0 %v636_v9 }
  0x1d   :  { %157 = vperm.xlu1 %612, %v17_v2   ;;  %203 = vperm.xlu0 %616, %v17_v2  }
  0x1e   :  { %613 = vset.pattern.permute.xlu2 %v632_v4 }
  0x1f   :  { %92 = vperm.xlu2 %613, %v18_v6  }
  0x25   :  { %614 = vset.pattern.permute.xlu1 %v637_v10  ;;  %622 = vset.pattern.permute.xlu0 %v633_v5 }
  0x26   :  { %180 = vperm.xlu1 %614, %v17_v2  }
  0x27   :  { %615 = vset.pattern.permute.xlu2 %v631_v3 }
  0x28   :  { %115 = vperm.xlu2 %615, %v18_v6  }
  0x2e   :  { %617 = vset.pattern.permute.xlu1 %v634_v7  ;;  %v212_v7 = vperm.slane %v713_v59, 1 }
  0x2f   :  { %138 = vperm.xlu1 %617, %v18_v6  }
  0x30   :  { %618 = vset.pattern.permute.xlu2 %v635_v8 }
  0x31   :  { %161 = vperm.xlu2 %618, %v18_v6  }
  0x37   :  { %619 = vset.pattern.permute.xlu1 %v637_v10 }
  0x38   :  { %184 = vperm.xlu1 %619, %v18_v6  }
  0x39   :  { %620 = vset.pattern.permute.xlu2 %v636_v9 }
  0x3a   :  { %207 = vperm.xlu2 %620, %v18_v6   ;;  %v211_v6 = vperm.slane %v713_v59, 0 }
  0x40   :  { %623 = vset.pattern.permute.xlu1 %v630_v1 }
  0x42   :  { %621 = vset.pattern.permute.xlu2 %v630_v1 }
  0x5e   :  { %v112_v11 = vpop.permute.xlu2 %111 }
  0x5f   :  { %v123_v55 = vmul.f32 %v119_v44, %v112_v11  ;;  %v124_v56 = vmul.f32 %v120_v45, %v112_v11  ;;  %v188_v11 = vperm.slane %v718_v62, 0 }
  0x67   :  { %v28_v14 = vpop.permute.xlu2 %27 }
  0x68   :  { %v37_v60 = vmul.f32 %v31_v18, %v28_v14  ;;  %v38_v61 = vmul.f32 %v32_v19, %v28_v14 }
  0x70   :  { %v135_v23 = vpop.permute.xlu2 %134 }
  0x71   :  { %v146_v63 = vmul.f32 %v142_v50, %v135_v23  ;;  %v147_v0 = vmul.f32 %v143_v51, %v135_v23 }
  0x74   :  { %v66_v12 = vpop.permute.xlu1 %65  ;;  %v23_v13 = vpop.permute.xlu0 %22 }
  0x75   :  { %v35_v25 = vmul.f32 %v31_v18, %v23_v13  ;;  %v36_v26 = vmul.f32 %v32_v19, %v23_v13  ;;  %v77_v35 = vmul.f32 %v73_v29, %v66_v12  ;;  %v78_v36 = vmul.f32 %v74_v30, %v66_v12 }
  0x76   :  { %v189_v12 = vperm.slane %v718_v62, 1 }
  0x79   :  { %v93_v42 = vpop.permute.xlu2 %92 }
  0x7a   :  { %v102_v31 = vmul.f32 %v96_v37, %v93_v42 }
  0x7d   :  { %v89_v17 = vpop.permute.xlu1 %88  ;;  %v43_v22 = vpop.permute.xlu0 %42 }
  0x7e   :  { %v54_v27 = vmul.f32 %v50_v20, %v43_v22  ;;  %v55_v28 = vmul.f32 %v51_v21, %v43_v22  ;;  %v100_v46 = vmul.f32 %v96_v37, %v89_v17  ;;  %v101_v47 = vmul.f32 %v97_v38, %v89_v17 }
  0x80   :  { %v58_v33 = vadd.f32 %v54_v27, %v35_v25  ;;  %v59_v34 = vadd.f32 %v55_v28, %v36_v26 }
  0x82   :  { %v81_v40 = vadd.f32 %v77_v35, %v58_v33  ;;  %v82_v41 = vadd.f32 %v78_v36, %v59_v34  ;;  %v116_v8 = vpop.permute.xlu2 %115 }
  0x84   :  { %v104_v52 = vadd.f32 %v100_v46, %v81_v40  ;;  %v105_v53 = vadd.f32 %v101_v47, %v82_v41  ;;  %v125_v41 = vmul.f32 %v119_v44, %v116_v8 }
  0x86   :  { %v47_v32 = vpop.permute.xlu1 %46  ;;  %v70_v48 = vpop.permute.xlu0 %69  ;;  %v127_v1 = vadd.f32 %v123_v55, %v104_v52  ;;  %v128_v2 = vadd.f32 %v124_v56, %v105_v53 }
  0x87   :  { %v56_v3 = vmul.f32 %v50_v20, %v47_v32  ;;  %v57_v4 = vmul.f32 %v51_v21, %v47_v32  ;;  %v79_v14 = vmul.f32 %v73_v29, %v70_v48  ;;  %v80_v15 = vmul.f32 %v74_v30, %v70_v48 }
  0x88   :  { %v150_v16 = vadd.f32 %v146_v63, %v127_v1  ;;  %v151_v17 = vadd.f32 %v147_v0, %v128_v2  ;;  %v103_v32 = vmul.f32 %v97_v38, %v93_v42  ;;  %v126_v38 = vmul.f32 %v120_v45, %v116_v8 }
  0x89   :  { %v60_v18 = vadd.f32 %v56_v3, %v37_v60  ;;  %v61_v19 = vadd.f32 %v57_v4, %v38_v61 }
  0x8b   :  { %v83_v33 = vadd.f32 %v79_v14, %v60_v18  ;;  %v84_v34 = vadd.f32 %v80_v15, %v61_v19  ;;  %v162_v30 = vpop.permute.xlu2 %161 }
  0x8c   :  { %v171_v55 = vmul.f32 %v165_v57, %v162_v30  ;;  %v172_v56 = vmul.f32 %v166_v58, %v162_v30 }
  0x8d   :  { %v106_v43 = vadd.f32 %v102_v31, %v83_v33  ;;  %v107_v37 = vadd.f32 %v103_v32, %v84_v34 }
  0x8f   :  { %v158_v54 = vpop.permute.xlu1 %157  ;;  %v204_v13 = vpop.permute.xlu0 %203  ;;  %v129_v49 = vadd.f32 %v125_v41, %v106_v43  ;;  %v130_v52 = vadd.f32 %v126_v38, %v107_v37 }
  0x90   :  { %v169_v9 = vmul.f32 %v165_v57, %v158_v54  ;;  %v170_v10 = vmul.f32 %v166_v58, %v158_v54  ;;  %v215_v21 = vmul.f32 %v211_v6, %v204_v13  ;;  %v216_v22 = vmul.f32 %v212_v7, %v204_v13 }
  0x92   :  { %v173_v23 = vadd.f32 %v169_v9, %v150_v16  ;;  %v174_v24 = vadd.f32 %v170_v10, %v151_v17 }
  0x94   :  { %v208_v59 = vpop.permute.xlu2 %207 }
  0x95   :  { %v217_v61 = vmul.f32 %v211_v6, %v208_v59  ;;  %v218_v62 = vmul.f32 %v212_v7, %v208_v59  ;;  %v812_v59 = vld [vmem:[%s1222_s3 + $0x1b0] sm:$0xff] }
  0x98   :  { %v181_v20 = vpop.permute.xlu1 %180 }
  0x99   :  { %v192_v25 = vmul.f32 %v188_v11, %v181_v20  ;;  %v193_v26 = vmul.f32 %v189_v12, %v181_v20  ;;  %v247_v20 = vld [vmem:[%s1221_s2] sm:$0xff] }
  0x9b   :  { %v196_v27 = vadd.f32 %v192_v25, %v173_v23  ;;  %v197_v28 = vadd.f32 %v193_v26, %v174_v24 }
  0x9d   :  { %v724_v35 = vadd.f32 %v215_v21, %v196_v27  ;;  %v726_v29 = vadd.f32 %v216_v22, %v197_v28 }
  0x9f   :  { %1228 = vst [vmem:[#allocation2_spill] sm:$0xff] %v724_v35  ;;  %v223_v36 = vadd.f32 %v726_v29, %v724_v35  ;;  %v229_v39 = vmul.f32 %v724_v35, %v724_v35  ;;  %v230_v40 = vmul.f32 %v726_v29, %v726_v29  ;;  %v1131_v35 = vld [vmem:[%s1222_s3 + $0x18] sm:$0xff] }
  0xa0   :  { %1229 = vst [vmem:[#allocation3_spill] sm:$0xff] %v726_v29  ;;  %v1119_v29 = vld [vmem:[%s1222_s3 + $0x8] sm:$0xff] }
  0xa1   :  { %v139_v42 = vpop.permute.xlu1 %138  ;;  %224 = vadd.xlane.f32.xlu0 %v223_v36  ;;  %v233_v46 = vadd.f32 %v230_v40, %v229_v39  ;;  %v751_v39 = vld [vmem:[%s1221_s2 + $0x8] sm:$0xff] }
  0xa2   :  { %v148_v47 = vmul.f32 %v142_v50, %v139_v42  ;;  %v149_v48 = vmul.f32 %v143_v51, %v139_v42  ;;  %v757_v42 = vld [vmem:[%s1222_s3 + $0x1e0] sm:$0xff] }
  0xa3   :  { %234 = vadd.xlane.f32.xlu1 %v233_v46  ;;  %v762_v46 = vld [vmem:[%s1222_s3 + $0x1e8] sm:$0xff]  ;;  %381 = vmatpush.msra.mxu0 %v757_v42 }
  0xa4   :  { %v152_v53 = vadd.f32 %v148_v47, %v129_v49  ;;  %v153_v54 = vadd.f32 %v149_v48, %v130_v52  ;;  %v767_v47 = vld [vmem:[%s1222_s3 + $0x1f0] sm:$0xff]  ;;  %404 = vmatpush.msra.mxu1 %v762_v46  ;;  %v774_v48 = vld [vmem:[%s1222_s3 + $0x1f8] sm:$0xff]  ;;  %v779_v49 = vld [vmem:[%s1222_s3 + $0x1c0] sm:$0xff] }
  0xa5   :  { %v784_v52 = vld [vmem:[%s1222_s3 + $0x1c8] sm:$0xff]  ;;  %427 = vmatpush.msra.mxu2 %v767_v47  ;;  %450 = vmatpush.msra.mxu3 %v774_v48 }
  0xa6   :  { %v175_v44 = vadd.f32 %v171_v55, %v152_v53  ;;  %v176_v63 = vadd.f32 %v172_v56, %v153_v54  ;;  %v790_v53 = vld [vmem:[%s1222_s3 + $0x1d0] sm:$0xff]  ;;  %v795_v54 = vld [vmem:[%s1222_s3 + $0x1d8] sm:$0xff]  ;;  %v800_v55 = vld [vmem:[%s1222_s3 + $0x1a0] sm:$0xff]  ;;  %382 = vmatpush.msra.mxu0 %v779_v49  ;;  %405 = vmatpush.msra.mxu1 %v784_v52 }
  0xa7   :  { %v807_v56 = vld [vmem:[%s1222_s3 + $0x1a8] sm:$0xff]  ;;  %428 = vmatpush.msra.mxu2 %v790_v53  ;;  %451 = vmatpush.msra.mxu3 %v795_v54 }
  0xa8   :  { %383 = vmatpush.msra.mxu0 %v800_v55  ;;  %406 = vmatpush.msra.mxu1 %v807_v56 }
  0xa9   :  { %429 = vmatpush.msra.mxu2 %v812_v59 }
  0xaa   :  { %v185_v60 = vpop.permute.xlu1 %184 }
  0xab   :  { %v194_v0 = vmul.f32 %v188_v11, %v185_v60  ;;  %v195_v45 = vmul.f32 %v189_v12, %v185_v60  ;;  %v819_v60 = vld [vmem:[%s1222_s3 + $0x1b8] sm:$0xff] }
  0xac   :  { %452 = vmatpush.msra.mxu3 %v819_v60 }
  0xad   :  { %v198_v1 = vadd.f32 %v194_v0, %v175_v44  ;;  %v199_v2 = vadd.f32 %v195_v45, %v176_v63  ;;  %v836_v44 = vld [vmem:[%s1222_s3 + $0x190] sm:$0xff]  ;;  %v843_v63 = vld [vmem:[%s1222_s3 + $0x198] sm:$0xff]  ;;  %v848_v0 = vld [vmem:[%s1222_s3 + $0x160] sm:$0xff] }
  0xae   :  { %v855_v45 = vld [vmem:[%s1222_s3 + $0x168] sm:$0xff]  ;;  %430 = vmatpush.msra.mxu2 %v836_v44  ;;  %453 = vmatpush.msra.mxu3 %v843_v63 }
  0xaf   :  { %v734_v3 = vadd.f32 %v217_v61, %v198_v1  ;;  %v736_v50 = vadd.f32 %v218_v62, %v199_v2  ;;  %v824_v61 = vld [vmem:[%s1222_s3 + $0x180] sm:$0xff]  ;;  %v831_v62 = vld [vmem:[%s1222_s3 + $0x188] sm:$0xff]  ;;  %v860_v1 = vld [vmem:[%s1222_s3 + $0x170] sm:$0xff] }
  0xb0   :  { %384 = vmatpush.msra.mxu0 %v824_v61  ;;  %407 = vmatpush.msra.mxu1 %v831_v62  ;;  %v867_v2 = vld [vmem:[%s1222_s3 + $0x178] sm:$0xff] }
  0xb1   :  { %1230 = vst [vmem:[#allocation4_spill] sm:$0xff] %v734_v3  ;;  %v226_v51 = vadd.f32 %v736_v50, %v734_v3  ;;  %v231_v57 = vmul.f32 %v734_v3, %v734_v3  ;;  %v232_v58 = vmul.f32 %v736_v50, %v736_v50  ;;  %431 = vmatpush.msra.mxu2 %v860_v1  ;;  %v1126_v3 = vld [vmem:[%s1222_s3 + $0x10] sm:$0xff] }
  0xb2   :  { %1231 = vst [vmem:[#allocation5_spill] sm:$0xff] %v736_v50  ;;  %385 = vmatpush.msra.mxu0 %v848_v0  ;;  %408 = vmatpush.msra.mxu1 %v855_v45  ;;  %v1114_v50 = vld [vmem:[%s1222_s3] sm:$0xff] }
  0xb3   :  { %227 = vadd.xlane.f32.xlu2 %v226_v51  ;;  %v236_v4 = vadd.f32 %v232_v58, %v231_v57  ;;  %v872_v51 = vld [vmem:[%s1222_s3 + $0x140] sm:$0xff]  ;;  %v879_v57 = vld [vmem:[%s1222_s3 + $0x148] sm:$0xff]  ;;  %v884_v58 = vld [vmem:[%s1222_s3 + $0x150] sm:$0xff]  ;;  %454 = vmatpush.msra.mxu3 %v867_v2 }
  0xb4   :  { %386 = vmatpush.msra.mxu0 %v872_v51  ;;  %409 = vmatpush.msra.mxu1 %v879_v57 }
  0xb5   :  { %432 = vmatpush.msra.mxu2 %v884_v58 }
  0xbb   :  { %237 = vadd.xlane.f32.xlu2 %v236_v4  ;;  %v891_v4 = vld [vmem:[%s1222_s3 + $0x158] sm:$0xff] }
  0xbc   :  { %455 = vmatpush.msra.mxu3 %v891_v4 }
 0x114   :  { %v225_v6 = vpop.xlane.xlu0 %224 }
 0x115   :  { %v239_v7 = vmul.f32 0.005, %v225_v6  ;;  %v896_v6 = vld [vmem:[%s1222_s3 + $0x120] sm:$0xff] }
 0x116   :  { %v235_v8 = vpop.xlane.xlu1 %234  ;;  %387 = vmatpush.msra.mxu0 %v896_v6 }
 0x117   :  { %v243_v9 = vmul.f32 %v239_v7, %v239_v7  ;;  %v241_v10 = vmul.f32 0.005, %v235_v8  ;;  %v908_v8 = vld [vmem:[%s1222_s3 + $0x130] sm:$0xff] }
 0x118   :  { %433 = vmatpush.msra.mxu2 %v908_v8 }
 0x119   :  { %v245_v11 = vsub.f32 %v241_v10, %v243_v9  ;;  %v915_v9 = vld [vmem:[%s1222_s3 + $0x138] sm:$0xff]  ;;  %v920_v10 = vld [vmem:[%s1222_s3 + $0x100] sm:$0xff] }
 0x11a   :  { %456 = vmatpush.msra.mxu3 %v915_v9  ;;  %388 = vmatpush.msra.mxu0 %v920_v10 }
 0x11b   :  { %v249_v12 = vadd.f32 1e-05, %v245_v11  ;;  %v927_v11 = vld [vmem:[%s1222_s3 + $0x108] sm:$0xff] }
 0x11d   :  { %625 = vrsqrt.f32 %v249_v12  ;;  %vm257_vm1 = vweird.f32 %v249_v12 }
 0x123   :  { %v626_v13 = vpop.eup %625 }
 0x124   :  { %v252_v14 = vmul.f32 %v626_v13, %v249_v12  ;;  %vm258_vm0 = vweird.f32 %v626_v13  ;;  %v932_v12 = vld [vmem:[%s1222_s3 + $0x110] sm:$0xff] }
 0x125   :  { %vm259_vm2 = vmor %vm257_vm1, %vm258_vm0  ;;  %434 = vmatpush.msra.mxu2 %v932_v12 }
 0x126   :  { %v253_v15 = vmul.f32 %v626_v13, %v252_v14  ;;  %v228_v16 = vpop.xlane.xlu2 %227  ;;  %v944_v14 = vld [vmem:[%s1222_s3 + $0xe0] sm:$0xff] }
 0x127   :  { %v240_v19 = vmul.f32 0.005, %v228_v16  ;;  %v956_v16 = vld [vmem:[%s1222_s3 + $0xf0] sm:$0xff]  ;;  %389 = vmatpush.msra.mxu0 %v944_v14 }
 0x128   :  { %v254_v17 = vmul.f32 0.5, %v253_v15  ;;  %v951_v15 = vld [vmem:[%s1222_s3 + $0xe8] sm:$0xff]  ;;  %435 = vmatpush.msra.mxu2 %v956_v16 }
 0x129   :  { %v244_v24 = vmul.f32 %v240_v19, %v240_v19 }
 0x12a   :  { %v255_v18 = vsub.f32 1.5, %v254_v17  ;;  %v963_v17 = vld [vmem:[%s1222_s3 + $0xf8] sm:$0xff] }
 0x12c   :  { %v256_v21 = vmul.f32 %v626_v13, %v255_v18  ;;  %v968_v18 = vld [vmem:[%s1222_s3 + $0xc0] sm:$0xff] }
 0x12d   :  { %390 = vmatpush.msra.mxu0 %v968_v18 }
 0x12e   :  { %v238_v22 = vpop.xlane.xlu2 %237  ;;  %v260_v23 = vsel %vm259_vm2, %v626_v13, %v256_v21  ;;  %v939_v13 = vld [vmem:[%s1222_s3 + $0x118] sm:$0xff] }
 0x12f   :  { %v242_v25 = vmul.f32 0.005, %v238_v22  ;;  %v271_v26 = vmul.f32 %v260_v23, %v247_v20  ;;  %457 = vmatpush.msra.mxu3 %v939_v13  ;;  %v987_v21 = vld [vmem:[%s1222_s3 + $0xd8] sm:$0xff]  ;;  %v992_v22 = vld [vmem:[%s1222_s3 + $0xa0] sm:$0xff]  ;;  %v999_v23 = vld [vmem:[%s1222_s3 + $0xa8] sm:$0xff] }
 0x130   :  { %391 = vmatpush.msra.mxu0 %v992_v22 }
 0x131   :  { %v246_v27 = vsub.f32 %v242_v25, %v244_v24  ;;  %287 = vperm.xlu2 %621, %v271_v26   ;;  %v273_v28 = vmul.f32 %v271_v26, %v239_v7  ;;  %v903_v7 = vld [vmem:[%s1222_s3 + $0x128] sm:$0xff]  ;;  %458 = vmatpush.msra.mxu3 %v963_v17  ;;  %v1004_v24 = vld [vmem:[%s1222_s3 + $0xb0] sm:$0xff]  ;;  %v1011_v25 = vld [vmem:[%s1222_s3 + $0xb8] sm:$0xff] }
 0x132   :  { %410 = vmatpush.msra.mxu1 %v903_v7  ;;  %v1016_v26 = vld [vmem:[%s1222_s3 + $0x80] sm:$0xff] }
 0x133   :  { %v250_v31 = vadd.f32 1e-05, %v246_v27  ;;  %277 = vrot.lane.b32.xlu0 %v273_v28, %s638_s11  ;;  %459 = vmatpush.msra.mxu3 %v987_v21  ;;  %v1023_v27 = vld [vmem:[%s1222_s3 + $0x88] sm:$0xff]  ;;  %v1028_v28 = vld [vmem:[%s1222_s3 + $0x90] sm:$0xff] }
 0x134   :  { %411 = vmatpush.msra.mxu1 %v927_v11  ;;  %392 = vmatpush.msra.mxu0 %v1016_v26 }
 0x135   :  { %627 = vrsqrt.f32 %v250_v31  ;;  %vm267_vm4 = vweird.f32 %v250_v31  ;;  %460 = vmatpush.msra.mxu3 %v1011_v25 }
 0x136   :  { %412 = vmatpush.msra.mxu1 %v951_v15 }
 0x139   :  { %624 = vset.pattern.permute.xlu2 %v633_v5 }
 0x13b   :  { %v628_v32 = vpop.eup %627 }
 0x13c   :  { %v262_v33 = vmul.f32 %v628_v32, %v250_v31  ;;  %vm268_vm3 = vweird.f32 %v628_v32  ;;  %v1035_v31 = vld [vmem:[%s1222_s3 + $0x98] sm:$0xff] }
 0x13d   :  { %vm269_vm5 = vmor %vm267_vm4, %vm268_vm3  ;;  %461 = vmatpush.msra.mxu3 %v1035_v31 }
 0x13e   :  { %v263_v34 = vmul.f32 %v628_v32, %v262_v33 }
 0x140   :  { %v264_v30 = vmul.f32 0.5, %v263_v34  ;;  %v1047_v34 = vld [vmem:[%s1222_s3 + $0x68] sm:$0xff] }
 0x142   :  { %v265_v36 = vsub.f32 1.5, %v264_v30 }
 0x144   :  { %v266_v40 = vmul.f32 %v628_v32, %v265_v36  ;;  %v1055_v36 = vld [vmem:[%s1222_s3 + $0x70] sm:$0xff] }
 0x146   :  { %v270_v41 = vsel %vm269_vm5, %v628_v32, %v266_v40  ;;  %v1040_v32 = vld [vmem:[%s1222_s3 + $0x60] sm:$0xff]  ;;  %v1060_v40 = vld [vmem:[%s1222_s3 + $0x78] sm:$0xff] }
 0x147   :  { %v272_v43 = vmul.f32 %v270_v41, %v751_v39  ;;  %393 = vmatpush.msra.mxu0 %v1040_v32  ;;  %v1072_v41 = vld [vmem:[%s1222_s3 + $0x48] sm:$0xff]  ;;  %462 = vmatpush.msra.mxu3 %v1060_v40 }
 0x149   :  { %v274_v37 = vmul.f32 %v272_v43, %v240_v19  ;;  %v975_v19 = vld [vmem:[%s1222_s3 + $0xc8] sm:$0xff] }
 0x14a   :  { %413 = vmatpush.msra.mxu1 %v975_v19 }
 0x14b   :  { %279 = vrot.lane.b32.xlu1 %v274_v37, %s638_s11  ;;  %v1083_v37 = vld [vmem:[%s1222_s3 + $0x58] sm:$0xff] }
 0x14c   :  { %414 = vmatpush.msra.mxu1 %v999_v23  ;;  %463 = vmatpush.msra.mxu3 %v1083_v37 }
 0x14e   :  { %415 = vmatpush.msra.mxu1 %v1023_v27 }
 0x150   :  { %416 = vmatpush.msra.mxu1 %v1047_v34 }
 0x152   :  { %417 = vmatpush.msra.mxu1 %v1072_v41 }
 0x153   :  { %292 = vperm.xlu1 %623, %v272_v43   ;;  %v1078_v43 = vld [vmem:[%s1222_s3 + $0x50] sm:$0xff] }
 0x1a5   :  { %v278_v5 = vpop.permute.xlu0 %277 }
 0x1a6   :  { %v283_v38 = vsub.f32 %v247_v20, %v278_v5  ;;  %v980_v20 = vld [vmem:[%s1222_s3 + $0xd0] sm:$0xff]  ;;  %v1090_v5 = vld [vmem:[%s1222_s3 + $0x20] sm:$0xff] }
 0x1a7   :  { %436 = vmatpush.msra.mxu2 %v980_v20 }
 0x1a8   :  { %301 = vperm.xlu0 %622, %v283_v38   ;;  %v1095_v38 = vld [vmem:[%s1222_s3 + $0x28] sm:$0xff] }
 0x1a9   :  { %437 = vmatpush.msra.mxu2 %v1004_v24  ;;  %418 = vmatpush.msra.mxu1 %v1095_v38 }
 0x1ab   :  { %438 = vmatpush.msra.mxu2 %v1028_v28  ;;  %419 = vmatpush.msra.mxu1 %v1119_v29 }
 0x1ad   :  { %439 = vmatpush.msra.mxu2 %v1055_v36  ;;  %504 = vmatpush.msrb.mxu1 %v762_v46  ;;  %v1232_v46 = vld [vmem:[#allocation2_spill] sm:$0xff] }
 0x1af   :  { %440 = vmatpush.msra.mxu2 %v1078_v43  ;;  %505 = vmatpush.msrb.mxu1 %v784_v52 }
 0x1b1   :  { %506 = vmatpush.msrb.mxu1 %v807_v56 }
 0x1b3   :  { %507 = vmatpush.msrb.mxu1 %v831_v62 }
 0x1b5   :  { %508 = vmatpush.msrb.mxu1 %v855_v45 }
 0x1b7   :  { %509 = vmatpush.msrb.mxu1 %v879_v57 }
 0x1b9   :  { %510 = vmatpush.msrb.mxu1 %v903_v7 }
 0x1bb   :  { %511 = vmatpush.msrb.mxu1 %v927_v11 }
 0x1bd   :  { %v280_v33 = vpop.permute.xlu1 %279  ;;  %512 = vmatpush.msrb.mxu1 %v951_v15 }
 0x1be   :  { %v284_v30 = vsub.f32 %v751_v39, %v280_v33  ;;  %v1067_v39 = vld [vmem:[%s1222_s3 + $0x40] sm:$0xff]  ;;  %v1102_v33 = vld [vmem:[%s1222_s3 + $0x30] sm:$0xff] }
 0x1bf   :  { %394 = vmatpush.msra.mxu0 %v1067_v39  ;;  %441 = vmatpush.msra.mxu2 %v1102_v33 }
 0x1c0   :  { %306 = vperm.xlu2 %624, %v284_v30   ;;  %v1107_v30 = vld [vmem:[%s1222_s3 + $0x38] sm:$0xff]  ;;  %513 = vmatpush.msrb.mxu1 %v975_v19 }
 0x1c1   :  { %395 = vmatpush.msra.mxu0 %v1090_v5  ;;  %464 = vmatpush.msra.mxu3 %v1107_v30 }
 0x1c2   :  { %442 = vmatpush.msra.mxu2 %v1126_v3  ;;  %514 = vmatpush.msrb.mxu1 %v999_v23 }
 0x1c3   :  { %396 = vmatpush.msra.mxu0 %v1114_v50  ;;  %465 = vmatpush.msra.mxu3 %v1131_v35 }
 0x1c4   :  { %527 = vmatpush.msrb.mxu2 %v767_v47  ;;  %515 = vmatpush.msrb.mxu1 %v1023_v27 }
 0x1c5   :  { %481 = vmatpush.msrb.mxu0 %v757_v42  ;;  %550 = vmatpush.msrb.mxu3 %v774_v48  ;;  %v288_v42 = vpop.permute.xlu2 %287  ;;  %v293_v52 = vpop.permute.xlu1 %292 }
 0x1c6   :  { %528 = vmatpush.msrb.mxu2 %v790_v53  ;;  %516 = vmatpush.msrb.mxu1 %v1047_v34  ;;  %v295_v47 = vmul.f32 %v288_v42, %v1232_v46 }
 0x1c7   :  { %482 = vmatpush.msrb.mxu0 %v779_v49  ;;  %551 = vmatpush.msrb.mxu3 %v795_v54 }
 0x1c8   :  { %529 = vmatpush.msrb.mxu2 %v812_v59  ;;  %517 = vmatpush.msrb.mxu1 %v1072_v41  ;;  %v1234_v59 = vld [vmem:[#allocation3_spill] sm:$0xff] }
 0x1c9   :  { %483 = vmatpush.msrb.mxu0 %v800_v55  ;;  %552 = vmatpush.msrb.mxu3 %v819_v60  ;;  %v1233_v55 = vld [vmem:[#allocation4_spill] sm:$0xff] }
 0x1ca   :  { %530 = vmatpush.msrb.mxu2 %v836_v44  ;;  %518 = vmatpush.msrb.mxu1 %v1095_v38  ;;  %v297_v56 = vmul.f32 %v293_v52, %v1233_v55 }
 0x1cb   :  { %484 = vmatpush.msrb.mxu0 %v824_v61  ;;  %553 = vmatpush.msrb.mxu3 %v843_v63  ;;  %v1235_v61 = vld [vmem:[#allocation5_spill] sm:$0xff] }
 0x1cc   :  { %531 = vmatpush.msrb.mxu2 %v860_v1  ;;  %519 = vmatpush.msrb.mxu1 %v1119_v29  ;;  %v298_v62 = vmul.f32 %v293_v52, %v1235_v61 }
 0x1cd   :  { %485 = vmatpush.msrb.mxu0 %v848_v0  ;;  %554 = vmatpush.msrb.mxu3 %v867_v2 }
 0x1ce   :  { %532 = vmatpush.msrb.mxu2 %v884_v58 }
 0x1cf   :  { %486 = vmatpush.msrb.mxu0 %v872_v51  ;;  %555 = vmatpush.msrb.mxu3 %v891_v4 }
 0x1d0   :  { %533 = vmatpush.msrb.mxu2 %v908_v8 }
 0x1d1   :  { %487 = vmatpush.msrb.mxu0 %v896_v6  ;;  %556 = vmatpush.msrb.mxu3 %v915_v9 }
 0x1d2   :  { %534 = vmatpush.msrb.mxu2 %v932_v12 }
 0x1d3   :  { %488 = vmatpush.msrb.mxu0 %v920_v10  ;;  %557 = vmatpush.msrb.mxu3 %v939_v13 }
 0x1d4   :  { %535 = vmatpush.msrb.mxu2 %v956_v16 }
 0x1d5   :  { %489 = vmatpush.msrb.mxu0 %v944_v14  ;;  %558 = vmatpush.msrb.mxu3 %v963_v17 }
 0x1d6   :  { %536 = vmatpush.msrb.mxu2 %v980_v20 }
 0x1d7   :  { %490 = vmatpush.msrb.mxu0 %v968_v18  ;;  %559 = vmatpush.msrb.mxu3 %v987_v21 }
 0x1d8   :  { %537 = vmatpush.msrb.mxu2 %v1004_v24 }
 0x1d9   :  { %491 = vmatpush.msrb.mxu0 %v992_v22  ;;  %560 = vmatpush.msrb.mxu3 %v1011_v25 }
 0x1da   :  { %538 = vmatpush.msrb.mxu2 %v1028_v28 }
 0x1db   :  { %492 = vmatpush.msrb.mxu0 %v1016_v26  ;;  %561 = vmatpush.msrb.mxu3 %v1035_v31 }
 0x1dc   :  { %539 = vmatpush.msrb.mxu2 %v1055_v36 }
 0x1dd   :  { %493 = vmatpush.msrb.mxu0 %v1040_v32  ;;  %562 = vmatpush.msrb.mxu3 %v1060_v40 }
 0x1de   :  { %540 = vmatpush.msrb.mxu2 %v1078_v43 }
 0x1df   :  { %494 = vmatpush.msrb.mxu0 %v1067_v39  ;;  %563 = vmatpush.msrb.mxu3 %v1083_v37 }
 0x1e0   :  { %541 = vmatpush.msrb.mxu2 %v1102_v33 }
 0x1e1   :  { %495 = vmatpush.msrb.mxu0 %v1090_v5  ;;  %564 = vmatpush.msrb.mxu3 %v1107_v30 }
 0x1e2   :  { %542 = vmatpush.msrb.mxu2 %v1126_v3  ;;  %v296_v3 = vmul.f32 %v288_v42, %v1234_v59 }
 0x1e3   :  { %496 = vmatpush.msrb.mxu0 %v1114_v50  ;;  %565 = vmatpush.msrb.mxu3 %v1131_v35 }
 0x21a   :  { %v302_v48 = vpop.permute.xlu0 %301  ;;  %v307_v54 = vpop.permute.xlu2 %306 }
 0x21b   :  { %v309_v49 = vadd.f32 %v302_v48, %v295_v47  ;;  %v311_v50 = vadd.f32 %v307_v54, %v297_v56  ;;  %v310_v35 = vadd.f32 %v302_v48, %v296_v3  ;;  %v312_v44 = vadd.f32 %v307_v54, %v298_v62 }
 0x21d   :  { %v313_v53 = vmax.f32 %v309_v49, 0.0  ;;  %v315_v29 = vmax.f32 %v311_v50, 0.0  ;;  %v314_v60 = vmax.f32 %v310_v35, 0.0  ;;  %v316_v63 = vmax.f32 %v312_v44, 0.0 }
 0x21f   :  { %397 = vmatmul.f32.vlgmr.msra.gmra.mxu0 %v313_v53  ;;  %420 = vmatmul.f32.vlgmr.msra.gmra.mxu1 %v313_v53 }
 0x220   :  { %443 = vmatmul.f32.vlgmr.msra.gmra.mxu2 %v313_v53  ;;  %466 = vmatmul.f32.vlgmr.msra.gmra.mxu3 %v313_v53 }
 0x227   :  { %400 = vmatmul.f32.gmra.mxu0 %v315_v29  ;;  %423 = vmatmul.f32.gmra.mxu1 %v315_v29 }
 0x228   :  { %446 = vmatmul.f32.gmra.mxu2 %v315_v29  ;;  %469 = vmatmul.f32.gmra.mxu3 %v315_v29 }
 0x22f   :  { %497 = vmatmul.f32.vlgmr.msrb.gmra.mxu0 %v314_v60  ;;  %520 = vmatmul.f32.vlgmr.msrb.gmra.mxu1 %v314_v60 }
 0x230   :  { %543 = vmatmul.f32.vlgmr.msrb.gmra.mxu2 %v314_v60  ;;  %566 = vmatmul.f32.vlgmr.msrb.gmra.mxu3 %v314_v60 }
 0x237   :  { %500 = vmatmul.f32.gmra.mxu0 %v316_v63  ;;  %523 = vmatmul.f32.gmra.mxu1 %v316_v63 }
 0x238   :  { %546 = vmatmul.f32.gmra.mxu2 %v316_v63  ;;  %569 = vmatmul.f32.gmra.mxu3 %v316_v63 }
 0x29c   :  { %v398_v0 = vpop.f32.mrf.mxu0  ;;  %v421_v45 = vpop.f32.mrf.mxu1 }
 0x29d   :  { %v473_v51 = vmax.f32 %v398_v0, %v421_v45 }
 0x2a3   :  { %v444_v1 = vpop.f32.mrf.mxu2  ;;  %v467_v2 = vpop.f32.mrf.mxu3 }
 0x2a4   :  { %v475_v57 = vmax.f32 %v444_v1, %v467_v2  ;;  %v401_v58 = vpop.f32.mrf.mxu0  ;;  %v424_v4 = vpop.f32.mrf.mxu1 }
 0x2a5   :  { %v474_v9 = vmax.f32 %v401_v58, %v424_v4 }
 0x2a6   :  { %v477_v6 = vmax.f32 %v473_v51, %v475_v57 }
 0x2a8   :  { %479 = vst [vmem:[%s1223_s4] sm:$0xff] %v477_v6 }
 0x2ab   :  { %v447_v7 = vpop.f32.mrf.mxu2  ;;  %v470_v8 = vpop.f32.mrf.mxu3 }
 0x2ac   :  { %v476_v10 = vmax.f32 %v447_v7, %v470_v8  ;;  %v498_v12 = vpop.f32.mrf.mxu0  ;;  %v521_v13 = vpop.f32.mrf.mxu1 }
 0x2ad   :  { %v573_v16 = vmax.f32 %v498_v12, %v521_v13 }
 0x2ae   :  { %v478_v11 = vmax.f32 %v474_v9, %v476_v10 }
 0x2b0   :  { %480 = vst [vmem:[%s1223_s4 + $0x8] sm:$0xff] %v478_v11 }
 0x2b3   :  { %v544_v14 = vpop.f32.mrf.mxu2  ;;  %v567_v15 = vpop.f32.mrf.mxu3 }
 0x2b4   :  { %v575_v17 = vmax.f32 %v544_v14, %v567_v15  ;;  %v501_v19 = vpop.f32.mrf.mxu0  ;;  %v524_v20 = vpop.f32.mrf.mxu1 }
 0x2b5   :  { %v574_v23 = vmax.f32 %v501_v19, %v524_v20 }
 0x2b6   :  { %v577_v18 = vmax.f32 %v573_v16, %v575_v17 }
 0x2b8   :  { %579 = vst [vmem:[%s1223_s4 + $0x10] sm:$0xff] %v577_v18 }
 0x2bb   :  { %v547_v21 = vpop.f32.mrf.mxu2  ;;  %v570_v22 = vpop.f32.mrf.mxu3 }
 0x2bc   :  { %v576_v24 = vmax.f32 %v547_v21, %v570_v22 }
 0x2be   :  { %v578_v25 = vmax.f32 %v574_v23, %v576_v24 }
 0x2c0   :  { %580 = vst [vmem:[%s1223_s4 + $0x18] sm:$0xff] %v578_v25 }

</bundles_post_ra>
